<compile_context>
chip_gen: v7x
topology: tpu7x:2x2x1
jax: 0.10.0
libtpu: 0.0.40
codegen_flags: <defaults>
</compile_context>

<pallas_src>
import math

import jax
import jax.numpy as jnp
from jax.experimental import pallas as pl
from jax.experimental.pallas import tpu as pltpu


# ----------------------------- helpers ---------------------------------------


def _round_up(x, m):
    return ((x + m - 1) // m) * m


_TRANSCENDENTAL_ACTS = ("sigmoid", "tanh", "softplus", "softmax")


def _apply_act(h, act):
    if act == "linear":
        return h
    if act == "sigmoid":
        return jax.nn.sigmoid(h)
    if act == "relu":
        return jnp.maximum(h, 0.0)
    if act == "tanh":
        return jnp.tanh(h)
    if act == "softplus":
        return jax.nn.softplus(h)
    if act == "leakyrelu":
        return jnp.where(h > 0, h, 0.2 * h)  # module uses nn.LeakyReLU(0.2)
    if act == "softmax":
        return jax.nn.softmax(h, axis=1)
    raise ValueError(f"Unexpected activation: {act}")


# ----------------------------- kernel ----------------------------------------


def make_mlp_kernel(activations):
    """Pallas kernel running the whole MLP for one batch tile on-chip.

    Kernel refs: (x, w0, b0, w1, b1, ..., out).  Weights/biases are full
    (VMEM-resident) tiles; x/out are per-grid-step batch tiles.  Both matmuls
    and the activations execute in one invocation so intermediates never touch
    HBM.
    """
    n_layers = len(activations)

    def kernel(*refs):
        x_ref = refs[0]
        o_ref = refs[-1]
        param_refs = refs[1:-1]
        assert len(param_refs) == 2 * n_layers

        h = x_ref[...]
        for i, act in enumerate(activations):
            w = param_refs[2 * i][...]       # bf16 weight (stored in MXU dtype)
            b = param_refs[2 * i + 1][...]   # f32 bias row [1, n]
            # MXU matmul: bf16 inputs, f32 accumulate; VPU bias add in f32.
            h = jnp.dot(h.astype(w.dtype), w, preferred_element_type=jnp.float32)
            h = h + b
            h = _apply_act(h, act)           # f32 element-wise / EUP
        o_ref[...] = h.astype(o_ref.dtype)

    return kernel


# ----------------------------- wrapper ----------------------------------------


class EnergyModelNetworkMLPPallas:
    """JAX/Pallas port of EnergyModelNetworkMLP."""

    def __init__(self, in_dim, out_dim, l_hidden=(50,), activation="sigmoid",
                 out_activation="linear", key=None,
                 param_dtype=jnp.bfloat16, block_batch=4096):
        l_neurons = tuple(l_hidden) + (out_dim,)
        if isinstance(activation, str):
            activation = (activation,) * len(l_hidden)
        self.activations = tuple(activation) + (out_activation,)
        self.in_dim = in_dim
        self.out_dim = out_dim
        self.param_dtype = param_dtype
        self.block_batch = int(block_batch)
        self._logical = (in_dim,) + l_neurons   # logical widths per layer boundary

        # Parameter init mirrors nn.Linear default: U(-k, k), k = 1/sqrt(fan_in),
        # with fan_in = *logical* input width.  Weights stored as
        # [fan_in_padded, fan_out_padded]; padded entries are exactly zero.
        if key is None:
            key = jax.random.PRNGKey(0)
        self.params = []  # flat list: w0, b0, w1, b1, ...
        prev_pad = in_dim
        for i, (n, act) in enumerate(zip(l_neurons, self.activations)):
            is_last = i == len(l_neurons) - 1
            # Lane-align hidden widths; never pad the final output or a softmax
            # layer (padding would perturb the softmax denominator).
            n_pad = n if (is_last or act == "softmax") else _round_up(n, 128)
            key, kw, kb = jax.random.split(key, 3)
            fan_in = self._logical[i]
            bound = 1.0 / math.sqrt(fan_in)
            w = jnp.zeros((prev_pad, n_pad), jnp.float32)
            w = w.at[:fan_in, :n].set(
                jax.random.uniform(kw, (fan_in, n), jnp.float32,
                                   minval=-bound, maxval=bound))
            b = jnp.zeros((1, n_pad), jnp.float32)
            b = b.at[:, :n].set(
                jax.random.uniform(kb, (1, n), jnp.float32,
                                   minval=-bound, maxval=bound))
            # Weights in the MXU feed dtype (converted once, not per grid step);
            # biases stay f32 so element-wise math is f32 on all generations.
            self.params.extend([w.astype(param_dtype), b])
            prev_pad = n_pad

        self._kernel = make_mlp_kernel(self.activations)

    def __call__(self, x):
        batch = x.shape[0]
        # bf16 input halves HBM bytes on the memory-bound read of x.
        x = x.astype(self.param_dtype)

        # Batch tile: large (amortizes ~0.35us/step grid overhead) but clamped
        # and 8-aligned for small batches.  Pad batch to a tile multiple.
        tb = min(self.block_batch, _round_up(max(batch, 1), 8))
        padded = _round_up(batch, tb)
        if padded != batch:
            x = jnp.pad(x, ((0, padded - batch), (0, 0)))
        grid = (padded // tb,)

        in_specs = [pl.BlockSpec((tb, self.in_dim), lambda i: (i, 0))]
        for p in self.params:
            # Constant index_map -> weights/biases stay resident across steps.
            in_specs.append(pl.BlockSpec(p.shape, lambda i: (0, 0)))
        out_specs = pl.BlockSpec((tb, self.out_dim), lambda i: (i, 0))

        # Scheduling hint for XLA.
        flops = 0
        transcendentals = 0
        for i, act in enumerate(self.activations):
            w = self.params[2 * i]
            flops += 2 * padded * w.shape[0] * w.shape[1]
            if act in _TRANSCENDENTAL_ACTS:
                transcendentals += padded * w.shape[1]
        bytes_accessed = (x.size * x.dtype.itemsize
                          + sum(p.size * p.dtype.itemsize for p in self.params)
                          + padded * self.out_dim * 4)
        cost = pl.CostEstimate(flops=flops, transcendentals=transcendentals,
                               bytes_accessed=bytes_accessed)

        out = pl.pallas_call(
            self._kernel,
            out_shape=jax.ShapeDtypeStruct((padded, self.out_dim), jnp.float32),
            grid_spec=pltpu.PrefetchScalarGridSpec(
                num_scalar_prefetch=0,
                grid=grid,
                in_specs=in_specs,
                out_specs=out_specs,
            ),
            compiler_params=pltpu.CompilerParams(
                dimension_semantics=("parallel",)),
            cost_estimate=cost,
        )(x, *self.params)
        return out[:batch]

    # Pure-JAX reference (uses the *unpadded* logical weight slices, so it also
    # validates that the zero-padding cannot leak into the result).
    def reference(self, x):
        h = x.astype(self.param_dtype)
        for i, act in enumerate(self.activations):
            fan_in = self._logical[i]
            n = self._logical[i + 1]
            w = self.params[2 * i][:fan_in, :n]
            b = self.params[2 * i + 1][:, :n]
            h = jnp.dot(h.astype(w.dtype), w,
                        preferred_element_type=jnp.float32) + b
            h = _apply_act(h, act)
        return h


# ------------------------------- main -----------------------------------------

if __name__ == "__main__":
    key = jax.random.PRNGKey(0)
    k_x, k_p = jax.random.split(key)

    # Small demo shapes matching the module defaults (hidden=50, out_dim=1).
    batch, in_dim, hidden, out_dim = 64, 16, 50, 1
    x = jax.random.normal(k_x, (batch, in_dim), jnp.float32)

    model = EnergyModelNetworkMLPPallas(
        in_dim=in_dim,
        out_dim=out_dim,
        l_hidden=(hidden,),
        activation="sigmoid",
        out_activation="linear",
        key=k_p,
    )

    y = jax.block_until_ready(model(x))
    y_ref = jax.block_until_ready(model.reference(x))

    assert y.shape == (batch, out_dim), y.shape
    err = float(jnp.max(jnp.abs(y - y_ref)))
    assert err < 1e-2, f"max abs err = {err}"

    print("KERNEL_OK")
</pallas_src>

<mosaic_0001>
module attributes {stable_mosaic.version = 11 : i64} {
  func.func @kernel(%arg0: i32, %arg1: memref<64x16xbf16, #tpu.memory_space<vmem>>, %arg2: memref<16x128xbf16, #tpu.memory_space<vmem>>, %arg3: memref<1x128xf32, #tpu.memory_space<vmem>>, %arg4: memref<128x1xbf16, #tpu.memory_space<vmem>>, %arg5: memref<1x1xf32, #tpu.memory_space<vmem>>, %arg6: memref<64x1xf32, #tpu.memory_space<vmem>>) attributes {dimension_semantics = [#tpu.dimension_semantics<parallel>], iteration_bounds = array<i64: 1>, scalar_prefetch = 0 : i64, scratch_operands = 0 : i64, tpu.core_type = #tpu.core_type<tc>, window_params = [{transform_indices = @transform_0, window_bounds = array<i64: 64, 16>}, {pipeline_mode = #tpu.pipeline_mode<synchronous>, transform_indices = @transform_1, window_bounds = array<i64: 16, 128>}, {pipeline_mode = #tpu.pipeline_mode<synchronous>, transform_indices = @transform_2, window_bounds = array<i64: 1, 128>}, {pipeline_mode = #tpu.pipeline_mode<synchronous>, transform_indices = @transform_3, window_bounds = array<i64: 128, 1>}, {pipeline_mode = #tpu.pipeline_mode<synchronous>, transform_indices = @transform_4, window_bounds = array<i64: 1, 1>}, {transform_indices = @transform_5, window_bounds = array<i64: 64, 1>}]} {
    %c0 = arith.constant 0 : index
    %c0_0 = arith.constant 0 : index
    %0 = vector.load %arg1[%c0, %c0_0] : memref<64x16xbf16, #tpu.memory_space<vmem>>, vector<64x16xbf16>
    %c0_1 = arith.constant 0 : index
    %c0_2 = arith.constant 0 : index
    %1 = vector.load %arg2[%c0_1, %c0_2] : memref<16x128xbf16, #tpu.memory_space<vmem>>, vector<16x128xbf16>
    %c0_3 = arith.constant 0 : index
    %c0_4 = arith.constant 0 : index
    %2 = vector.load %arg3[%c0_3, %c0_4] : memref<1x128xf32, #tpu.memory_space<vmem>>, vector<1x128xf32>
    %cst = arith.constant dense<0.000000e+00> : vector<64x128xf32>
    %3 = tpu.matmul %0, %1, %cst {dimension_numbers = #tpu.dot_dimension_numbers<[1], [0], [0], [1], [0, 0, 1, 1], [], []>} : vector<64x16xbf16>, vector<16x128xbf16>, vector<64x128xf32> -> vector<64x128xf32>
    %4 = vector.broadcast %2 : vector<1x128xf32> to vector<64x128xf32>
    %5 = arith.addf %3, %4 : vector<64x128xf32>
    %6 = arith.negf %5 : vector<64x128xf32>
    %7 = math.exp %6 : vector<64x128xf32>
    %cst_5 = arith.constant 1.000000e+00 : f32
    %8 = vector.broadcast %cst_5 : f32 to vector<64x128xf32>
    %9 = arith.addf %8, %7 : vector<64x128xf32>
    %10 = arith.divf %8, %9 : vector<64x128xf32>
    %c0_6 = arith.constant 0 : index
    %c0_7 = arith.constant 0 : index
    %11 = vector.load %arg4[%c0_6, %c0_7] : memref<128x1xbf16, #tpu.memory_space<vmem>>, vector<128x1xbf16>
    %c0_8 = arith.constant 0 : index
    %c0_9 = arith.constant 0 : index
    %12 = vector.load %arg5[%c0_8, %c0_9] : memref<1x1xf32, #tpu.memory_space<vmem>>, vector<1x1xf32>
    %13 = arith.truncf %10 : vector<64x128xf32> to vector<64x128xbf16>
    %cst_10 = arith.constant dense<0.000000e+00> : vector<64x1xf32>
    %14 = tpu.matmul %13, %11, %cst_10 {dimension_numbers = #tpu.dot_dimension_numbers<[1], [0], [0], [1], [0, 0, 1, 1], [], []>} : vector<64x128xbf16>, vector<128x1xbf16>, vector<64x1xf32> -> vector<64x1xf32>
    %15 = vector.broadcast %12 : vector<1x1xf32> to vector<64x1xf32>
    %16 = arith.addf %14, %15 : vector<64x1xf32>
    %c0_11 = arith.constant 0 : index
    %c0_12 = arith.constant 0 : index
    %17 = vector.load %arg6[%c0_11, %c0_12] : memref<64x1xf32, #tpu.memory_space<vmem>>, vector<64x1xf32>
    tpu.vector_store %arg6[%c0_11, %c0_12], %16 {strides = array<i32>} : memref<64x1xf32, #tpu.memory_space<vmem>>, vector<64x1xf32>,
    return
  }
  func.func @transform_0(%arg0: i32) -> (i32, i32) {
    %c0_i32 = arith.constant 0 : i32
    %c0_i32_0 = arith.constant 0 : i32
    return %arg0, %c0_i32 : i32, i32
  }
  func.func @transform_1(%arg0: i32) -> (i32, i32) {
    %c0_i32 = arith.constant 0 : i32
    %c0_i32_0 = arith.constant 0 : i32
    %c0_i32_1 = arith.constant 0 : i32
    return %c0_i32, %c0_i32_0 : i32, i32
  }
  func.func @transform_2(%arg0: i32) -> (i32, i32) {
    %c0_i32 = arith.constant 0 : i32
    %c0_i32_0 = arith.constant 0 : i32
    %c0_i32_1 = arith.constant 0 : i32
    return %c0_i32, %c0_i32_0 : i32, i32
  }
  func.func @transform_3(%arg0: i32) -> (i32, i32) {
    %c0_i32 = arith.constant 0 : i32
    %c0_i32_0 = arith.constant 0 : i32
    %c0_i32_1 = arith.constant 0 : i32
    return %c0_i32, %c0_i32_0 : i32, i32
  }
  func.func @transform_4(%arg0: i32) -> (i32, i32) {
    %c0_i32 = arith.constant 0 : i32
    %c0_i32_0 = arith.constant 0 : i32
    %c0_i32_1 = arith.constant 0 : i32
    return %c0_i32, %c0_i32_0 : i32, i32
  }
  func.func @transform_5(%arg0: i32) -> (i32, i32) {
    %c0_i32 = arith.constant 0 : i32
    %c0_i32_0 = arith.constant 0 : i32
    return %arg0, %c0_i32 : i32, i32
  }
}

</mosaic_0001>

<bundles_post_ra>
// kernel: tpu_custom_call.1
= control target key start
LH: loop header
LB: loop body
LE: loop exit
PB: predicated region body
PF: predicated region fallthrough
CT: control target
= control target key end

     0   :  { %vm66_vm0 = vcmask 130048   ;;  %vm332_vm1 = vcmask 7168   ;;  %s591_s1 = inlined_call_operand.vmem [shape: bf16[16,128], index: 1, kind: input, shape index: {}]   ;;  %s592_s0 = inlined_call_operand.vmem [shape: bf16[64,16], index: 0, kind: input, shape index: {}]   ;;  %s593_s3 = inlined_call_operand.vmem [shape: bf16[128,1], index: 3, kind: input, shape index: {}]   ;;  %s594_s4 = inlined_call_operand.<no memory space> [shape: f32[1,1], index: 4, kind: input, shape index: {}]   ;;  %s595_s2 = inlined_call_operand.vmem [shape: f32[1,128], index: 2, kind: input, shape index: {}]   ;;  %s596_s5 = inlined_call_operand.vmem [shape: f32[64,1], index: 5, kind: output, shape index: {}]  }
   0x1   :  { %v439_v0 = vld [vmem:[%s591_s1] sm:$0xff]   ;;  %v441_v2 = vld [vmem:[%s592_s0 + $0x8] sm:$0xff]   ;;  %v442_v3 = vld [vmem:[%s592_s0 + $0x10] sm:$0xff]   ;;  %v10_v13 = vstv %s594_s4 }
   0x2   :  { %v440_v1 = vld [vmem:[%s592_s0] sm:$0xff]   ;;  %389 = vmatprep.subr.bf16.mxu0 %v439_v0  ;;  %v443_v4 = vld [vmem:[%s592_s0 + $0x18] sm:$0xff]   ;;  %v445_v6 = vld [vmem:[%s593_s3 + $0x8] sm:$0xff]   ;;  %11 = vst [vmem:[#allocation2] sm:$0x1] %v10_v13 }
   0x3   :  { %390 = vmatpush3.bf16.msra.mxu0 %v439_v0  ;;  %391 = vmatprep.mubr.msk.bf16.mxu0 %vm66_vm0, %v440_v1  ;;  %v444_v5 = vld [vmem:[%s593_s3] sm:$0xff]   ;;  %v446_v7 = vld [vmem:[%s593_s3 + $0x10] sm:$0xff]   ;;  %v447_v8 = vld [vmem:[%s593_s3 + $0x18] sm:$0xff]  }
   0x4   :  { %399 = vmatprep.subr.bf16.mxu0 %v444_v5  ;;  %423 = vmatprep.subr.bf16.mxu1 %v444_v5  ;;  %v448_v9 = vld [vmem:[%s593_s3 + $0x20] sm:$0xff]   ;;  %v449_v10 = vld [vmem:[%s593_s3 + $0x28] sm:$0xff]   ;;  %v450_v11 = vld [vmem:[%s593_s3 + $0x30] sm:$0xff]  }
   0x5   :  { %431 = vmatpush3.bf16.msra.mxu1 %v444_v5  ;;  %v451_v12 = vld [vmem:[%s593_s3 + $0x38] sm:$0xff]   ;;  %v345_v14 = vld [vmem:[%s595_s2] ss:$0 sm:$0xff] }
   0x6   :  { %392 = vmatmul.mubr.msk.bf16.vlgmr.msra.gmra.mrb[0].mxu0 %vm66_vm0, %v441_v2  ;;  %424 = vmatprep.subr.bf16.mxu1 %v445_v6 }
   0x7   :  { %395 = vmatprep.mubr.msk.bf16.mxu0 %vm66_vm0, %v442_v3  ;;  %400 = vmatpush3.bf16.msra.mxu0 %v444_v5 }
   0x8   :  { %401 = vmatprep.subr.bf16.mxu0 %v445_v6 }
   0x9   :  { %432 = vmatpush3.bf16.msra.mxu1 %v445_v6  ;;  %v363_v3 = vld [vmem:[#allocation2] ss:$0 sm:$0xff] }
   0xa   :  { %425 = vmatprep.subr.bf16.mxu1 %v446_v7 }
   0xb   :  { %402 = vmatpush3.bf16.msra.mxu0 %v445_v6 }
   0xc   :  { %403 = vmatprep.subr.bf16.mxu0 %v446_v7 }
   0xd   :  { %433 = vmatpush3.bf16.msra.mxu1 %v446_v7 }
   0xe   :  { %396 = vmatmul.mubr.msk.bf16.gmra.mrb[4].mxu0 %vm66_vm0, %v443_v4  ;;  %426 = vmatprep.subr.bf16.mxu1 %v447_v8 }
   0xf   :  { %404 = vmatpush3.bf16.msra.mxu0 %v446_v7 }
  0x10   :  { %405 = vmatprep.subr.bf16.mxu0 %v447_v8 }
  0x11   :  { %434 = vmatpush3.bf16.msra.mxu1 %v447_v8 }
  0x12   :  { %427 = vmatprep.subr.bf16.mxu1 %v448_v9 }
  0x13   :  { %406 = vmatpush3.bf16.msra.mxu0 %v447_v8 }
  0x14   :  { %407 = vmatprep.subr.bf16.mxu0 %v448_v9 }
  0x15   :  { %435 = vmatpush3.bf16.msra.mxu1 %v448_v9 }
  0x16   :  { %428 = vmatprep.subr.bf16.mxu1 %v449_v10 }
  0x17   :  { %408 = vmatpush3.bf16.msra.mxu0 %v448_v9 }
  0x18   :  { %409 = vmatprep.subr.bf16.mxu0 %v449_v10 }
  0x19   :  { %436 = vmatpush3.bf16.msra.mxu1 %v449_v10 }
  0x1a   :  { %429 = vmatprep.subr.bf16.mxu1 %v450_v11 }
  0x1b   :  { %410 = vmatpush3.bf16.msra.mxu0 %v449_v10 }
  0x1c   :  { %411 = vmatprep.subr.bf16.mxu0 %v450_v11 }
  0x1d   :  { %437 = vmatpush3.bf16.msra.mxu1 %v450_v11 }
  0x1e   :  { %430 = vmatprep.subr.bf16.mxu1 %v451_v12 }
  0x1f   :  { %412 = vmatpush3.bf16.msra.mxu0 %v450_v11 }
  0x20   :  { %413 = vmatprep.subr.bf16.mxu0 %v451_v12 }
  0x21   :  { %438 = vmatpush3.bf16.msra.mxu1 %v451_v12 }
  0x23   :  { %414 = vmatpush3.bf16.msra.mxu0 %v451_v12 }
  0xd9   :  { %v393_v15 = vpop.f32.mrb[0].mxu0 }
  0xda   :  { %v122_v16 = vadd.f32 %v393_v15, %v345_v14  ;;  %v113_v17 = vpop.f32.mrb[1].mxu0 }
  0xdb   :  { %v114_v18 = vadd.f32 %v345_v14, %v113_v17  ;;  %v394_v19 = vpop.f32.mrb[2].mxu0 }
  0xdc   :  { %v357_v20 = vmul.f32 -1.442695, %v122_v16  ;;  %v125_v21 = vadd.f32 %v394_v19, %v345_v14  ;;  %v116_v22 = vpop.f32.mrb[3].mxu0 }
  0xdd   :  { %v355_v23 = vmul.f32 -1.442695, %v114_v18  ;;  %v117_v24 = vadd.f32 %v345_v14, %v116_v22 }
  0xde   :  { %452 = vpow2.f32 %v357_v20  ;;  %v358_v25 = vmul.f32 -1.442695, %v125_v21 }
  0xdf   :  { %454 = vpow2.f32 %v355_v23  ;;  %v356_v26 = vmul.f32 -1.442695, %v117_v24 }
  0xe0   :  { %456 = vpow2.f32 %v358_v25 }
  0xe1   :  { %458 = vpow2.f32 %v356_v26  ;;  %v397_v27 = vpop.f32.mrb[4].mxu0 }
  0xe2   :  { %v138_v28 = vadd.f32 %v397_v27, %v345_v14  ;;  %v129_v29 = vpop.f32.mrb[5].mxu0 }
  0xe3   :  { %v130_v30 = vadd.f32 %v345_v14, %v129_v29  ;;  %v398_v31 = vpop.f32.mrb[6].mxu0 }
  0xe4   :  { %v361_v32 = vmul.f32 -1.442695, %v138_v28  ;;  %v141_v33 = vadd.f32 %v398_v31, %v345_v14  ;;  %v132_v34 = vpop.f32.mrb[7].mxu0 }
  0xe5   :  { %v359_v35 = vmul.f32 -1.442695, %v130_v30  ;;  %v133_v36 = vadd.f32 %v345_v14, %v132_v34 }
  0xe6   :  { %460 = vpow2.f32 %v361_v32  ;;  %v362_v37 = vmul.f32 -1.442695, %v141_v33 }
  0xe7   :  { %462 = vpow2.f32 %v359_v35  ;;  %v360_v38 = vmul.f32 -1.442695, %v133_v36 }
  0xe8   :  { %v453_v39 = vpop.eup %452  ;;  %464 = vpow2.f32 %v362_v37 }
  0xe9   :  { %v455_v40 = vpop.eup %454  ;;  %v170_v41 = vadd.f32 1.0, %v453_v39  ;;  %466 = vpow2.f32 %v360_v38 }
  0xea   :  { %v457_v42 = vpop.eup %456  ;;  %v168_v43 = vadd.f32 1.0, %v455_v40 }
  0xeb   :  { %v459_v44 = vpop.eup %458  ;;  %468 = vrcp.f32 %v170_v41  ;;  %v171_v45 = vadd.f32 1.0, %v457_v42 }
  0xec   :  { %470 = vrcp.f32 %v168_v43  ;;  %v169_v46 = vadd.f32 1.0, %v459_v44 }
  0xed   :  { %472 = vrcp.f32 %v171_v45 }
  0xee   :  { %474 = vrcp.f32 %v169_v46 }
  0xf0   :  { %v461_v47 = vpop.eup %460 }
  0xf1   :  { %v463_v48 = vpop.eup %462  ;;  %v174_v49 = vadd.f32 1.0, %v461_v47 }
  0xf2   :  { %v465_v50 = vpop.eup %464  ;;  %v172_v51 = vadd.f32 1.0, %v463_v48 }
  0xf3   :  { %v467_v52 = vpop.eup %466  ;;  %476 = vrcp.f32 %v174_v49  ;;  %v175_v53 = vadd.f32 1.0, %v465_v50 }
  0xf4   :  { %478 = vrcp.f32 %v172_v51  ;;  %v173_v54 = vadd.f32 1.0, %v467_v52 }
  0xf5   :  { %v469_v55 = vpop.eup %468  ;;  %480 = vrcp.f32 %v175_v53 }
  0xf6   :  { %v471_v56 = vpop.eup %470  ;;  %482 = vrcp.f32 %v173_v54 }
  0xf7   :  { %v473_v57 = vpop.eup %472 }
  0xf8   :  { %v475_v58 = vpop.eup %474  ;;  %v210_v59 = vpack.c.bf16 %v473_v57, %v469_v55 }
  0xf9   :  { %v209_v60 = vpack.c.bf16 %v475_v58, %v471_v56 }
  0xfb   :  { %415 = vmatprep.mubr.bf16.mxu0 %v209_v60 }
  0xfc   :  { %416 = vmatmul.mubr.bf16.vlgmr.msra.gmra.mrb[8].mxu0 %v210_v59 }
  0xfd   :  { %v477_v61 = vpop.eup %476 }
  0xfe   :  { %v479_v62 = vpop.eup %478 }
  0xff   :  { %v481_v63 = vpop.eup %480 }
 0x100   :  { %v483_v0 = vpop.eup %482  ;;  %v212_v1 = vpack.c.bf16 %v481_v63, %v477_v61 }
 0x101   :  { %v211_v2 = vpack.c.bf16 %v483_v0, %v479_v62 }
 0x103   :  { %419 = vmatprep.mubr.bf16.mxu1 %v211_v2 }
 0x104   :  { %420 = vmatmul.mubr.bf16.vlgmr.msra.gmra.mrb[0].mxu1 %v212_v1 }
 0x1cf   :  { %v417_v4 = vpop.f32.mrb[8].mxu0 }
 0x1d0   :  { %v310_v5 = vadd.f32 %v417_v4, %v363_v3  ;;  %v301_v6 = vpop.f32.mrb[9].mxu0 }
 0x1d1   :  { %v302_v7 = vadd.f32 %v363_v3, %v301_v6  ;;  %v418_v8 = vpop.f32.mrb[10].mxu0 }
 0x1d2   :  { %335 = vst.msk [vmem:[%s596_s5 + $0x10] sm:$0xff] %vm332_vm1, %v310_v5  ;;  %v313_v9 = vadd.f32 %v418_v8, %v363_v3  ;;  %v304_v10 = vpop.f32.mrb[11].mxu0 }
 0x1d3   :  { %333 = vst.msk [vmem:[%s596_s5] sm:$0xff] %vm332_vm1, %v302_v7  ;;  %v305_v11 = vadd.f32 %v363_v3, %v304_v10 }
 0x1d4   :  { %336 = vst.msk [vmem:[%s596_s5 + $0x18] sm:$0xff] %vm332_vm1, %v313_v9 }
 0x1d5   :  { %334 = vst.msk [vmem:[%s596_s5 + $0x8] sm:$0xff] %vm332_vm1, %v305_v11 }
 0x1d7   :  { %v421_v12 = vpop.f32.mrb[0].mxu1 }
 0x1d8   :  { %v326_v13 = vadd.f32 %v421_v12, %v363_v3  ;;  %v317_v14 = vpop.f32.mrb[1].mxu1 }
 0x1d9   :  { %v318_v15 = vadd.f32 %v363_v3, %v317_v14  ;;  %v422_v16 = vpop.f32.mrb[2].mxu1 }
 0x1da   :  { %339 = vst.msk [vmem:[%s596_s5 + $0x30] sm:$0xff] %vm332_vm1, %v326_v13  ;;  %v329_v17 = vadd.f32 %v422_v16, %v363_v3  ;;  %v320_v18 = vpop.f32.mrb[3].mxu1 }
 0x1db   :  { %337 = vst.msk [vmem:[%s596_s5 + $0x20] sm:$0xff] %vm332_vm1, %v318_v15  ;;  %v321_v19 = vadd.f32 %v363_v3, %v320_v18 }
 0x1dc   :  { %340 = vst.msk [vmem:[%s596_s5 + $0x38] sm:$0xff] %vm332_vm1, %v329_v17 }
 0x1dd   :  { %338 = vst.msk [vmem:[%s596_s5 + $0x28] sm:$0xff] %vm332_vm1, %v321_v19 }

</bundles_post_ra>
